<compile_context>
chip_gen: v7x
topology: tpu7x:2x2x1
jax: 0.10.0
libtpu: 0.0.40
codegen_flags: <defaults>
</compile_context>

<pallas_src>
import functools

import jax
import jax.numpy as jnp
from jax import lax
from jax.experimental import pallas as pl
from jax.experimental.pallas import tpu as pltpu

LANES = 128


def _round_up(x, m):
    return (x + m - 1) // m * m


def _vmem_capacity_bytes():
    # Generation-aware physical VMEM (v5e/v6e: 128 MiB, v7x: 64 MiB per TC).
    try:
        return int(pltpu.get_tpu_info().vmem_capacity_bytes)
    except Exception:
        return 64 << 20  # conservative (v7x) if the query is unavailable


def _clamp_vmem(nbytes, cap):
    # Raise the scoped-VMEM limit when needed but always leave headroom below
    # this generation's physical VMEM.
    return int(min(max(nbytes, 32 << 20), cap - (4 << 20)))


def _largest_divisor(n, candidates):
    for c in candidates:
        if c <= n and n % c == 0:
            return c
    return n


# ----------------------------------------------------------------------------
# Fused kernel: all GCN layers in one pallas_call, A_norm resident in VMEM
# ----------------------------------------------------------------------------
def fused_gcn_kernel(a_ref, x_ref, w_ref, b_ref, o_ref, h_ref, *, num_layers):
    # a_ref: [Np, Np] bf16  (DMA'd HBM->VMEM once, resident for ALL layers)
    # x_ref: [Np, Cp] bf16
    # w_ref: [L, Cp, Cp] bf16 (zero-padded per layer)
    # b_ref: [L, 1,  Cp] f32  (zero-padded per layer)
    # o_ref: [Np, Cp] f32
    # h_ref: [Np, Cp] bf16 scratch activation buffer.
    # A fori_loop (body traced once) bounds the f32 xw/agg live ranges, unlike
    # a statically unrolled Python loop.
    h_ref[...] = x_ref[...]

    def layer(i, carry):
        xw = jnp.dot(h_ref[...], w_ref[i], preferred_element_type=jnp.float32)
        agg = jnp.dot(a_ref[...], xw.astype(jnp.bfloat16),
                      preferred_element_type=jnp.float32)
        h_ref[...] = jnp.maximum(agg + b_ref[i], 0.0).astype(h_ref.dtype)
        return carry

    lax.fori_loop(0, num_layers - 1, layer, 0)

    last = num_layers - 1
    xw = jnp.dot(h_ref[...], w_ref[last], preferred_element_type=jnp.float32)
    agg = jnp.dot(a_ref[...], xw.astype(jnp.bfloat16),
                  preferred_element_type=jnp.float32)
    o_ref[...] = (agg + b_ref[last]).astype(o_ref.dtype)


def _fused_vmem_need(n_pad, c_pad, num_layers):
    return (n_pad * n_pad * 2                              # A bf16
            + n_pad * c_pad * (2 + 4 + 2)                  # X bf16 + out f32 + h scratch
            + num_layers * (c_pad * c_pad * 2 + c_pad * 4)  # W + b stacks
            + 3 * n_pad * c_pad * 4                        # in-kernel f32 xw/agg temps
            + (4 << 20))                                   # misc headroom


def mesh_gcn_fused(a_pad, x_pad, w_stack, b_stack, vmem_cap):
    n_pad, c_pad = x_pad.shape
    num_layers = w_stack.shape[0]

    bytes_accessed = (n_pad * n_pad * 2 + n_pad * c_pad * (2 + 4)
                      + num_layers * (c_pad * c_pad * 2 + c_pad * 4))
    flops = num_layers * (2 * n_pad * c_pad * c_pad + 2 * n_pad * n_pad * c_pad)
    vmem_need = _fused_vmem_need(n_pad, c_pad, num_layers)

    return pl.pallas_call(
        functools.partial(fused_gcn_kernel, num_layers=num_layers),
        out_shape=jax.ShapeDtypeStruct((n_pad, c_pad), jnp.float32),
        in_specs=[
            pl.BlockSpec(memory_space=pltpu.MemorySpace.VMEM),  # A_norm (bf16)
            pl.BlockSpec(memory_space=pltpu.MemorySpace.VMEM),  # X (bf16)
            pl.BlockSpec(memory_space=pltpu.MemorySpace.VMEM),  # W stack (bf16)
            pl.BlockSpec(memory_space=pltpu.MemorySpace.VMEM),  # b stack (f32)
        ],
        out_specs=pl.BlockSpec(memory_space=pltpu.MemorySpace.VMEM),
        scratch_shapes=[pltpu.VMEM((n_pad, c_pad), jnp.bfloat16)],
        cost_estimate=pl.CostEstimate(flops=int(flops), transcendentals=0,
                                      bytes_accessed=int(bytes_accessed)),
        compiler_params=pltpu.CompilerParams(
            vmem_limit_bytes=_clamp_vmem(vmem_need, vmem_cap)),
    )(a_pad, x_pad, w_stack, b_stack)


# ----------------------------------------------------------------------------
# Tiled fallback (large meshes)
#   layer i: stream A once (big row/k tiles), keep XW_i fully VMEM-resident,
#   and fuse relu(.)@W_{i+1} into the epilogue so the output IS next-layer XW.
# ----------------------------------------------------------------------------
def xw_kernel(x_ref, w_ref, o_ref):
    o_ref[...] = jnp.dot(x_ref[...], w_ref[...],
                         preferred_element_type=jnp.float32).astype(o_ref.dtype)


def compute_xw(x, w, *, tile_rows, vmem_cap):
    """Layer-0 only: XW0 = X @ W0 with large row tiles."""
    n_pad, c_in = x.shape
    c_out = w.shape[1]
    grid = (n_pad // tile_rows,)
    bytes_accessed = n_pad * (c_in + c_out) * 2 + c_in * c_out * 2
    vmem_need = 2 * tile_rows * (c_in + c_out) * 2 + 2 * c_in * c_out * 2 + (2 << 20)
    return pl.pallas_call(
        xw_kernel,
        out_shape=jax.ShapeDtypeStruct((n_pad, c_out), jnp.bfloat16),
        grid_spec=pltpu.PrefetchScalarGridSpec(
            num_scalar_prefetch=0,
            grid=grid,
            in_specs=[
                pl.BlockSpec((tile_rows, c_in), lambda r: (r, 0)),
                pl.BlockSpec((c_in, c_out), lambda r: (0, 0)),   # W resident
            ],
            out_specs=pl.BlockSpec((tile_rows, c_out), lambda r: (r, 0)),
        ),
        cost_estimate=pl.CostEstimate(flops=int(2 * n_pad * c_in * c_out),
                                      transcendentals=0,
                                      bytes_accessed=int(bytes_accessed)),
        compiler_params=pltpu.CompilerParams(
            dimension_semantics=("parallel",),
            vmem_limit_bytes=_clamp_vmem(vmem_need, vmem_cap)),
    )(x, w)


def agg_kernel(a_ref, xw_ref, b_ref, wn_ref, o_ref, acc_ref, *, tile_k, project):
    # a_ref : [tile_rows, tile_k] bf16  (streamed (r,k) tile of A_norm)
    # xw_ref: [Np, Cp]            bf16  (FULLY VMEM-resident: constant index_map
    #                                    -> DMA'd once, sliced in-kernel along k)
    # b_ref : [1, Cp]             f32
    # wn_ref: [Cp, Cp]            bf16  (next layer's W; unused if project=False)
    # o_ref : [tile_rows, Cp]
    # acc_ref: [tile_rows, Cp]    f32 accumulator scratch
    k = pl.program_id(1)

    @pl.when(k == 0)
    def _():
        acc_ref[...] = jnp.zeros_like(acc_ref)

    ks = pl.multiple_of(k * tile_k, tile_k)
    acc_ref[...] += jnp.dot(a_ref[...], xw_ref[pl.ds(ks, tile_k), :],
                            preferred_element_type=jnp.float32)

    @pl.when(k == pl.num_programs(1) - 1)
    def _():
        out = acc_ref[...] + b_ref[...]
        if project:
            # Fuse ReLU + next layer's X@W into the epilogue: the kernel output
            # IS xw_{i+1} (saves a launch + an h/XW HBM round trip per layer).
            h = jnp.maximum(out, 0.0).astype(jnp.bfloat16)
            o_ref[...] = jnp.dot(h, wn_ref[...],
                                 preferred_element_type=jnp.float32
                                 ).astype(o_ref.dtype)
        else:
            o_ref[...] = out.astype(o_ref.dtype)


def gcn_agg_layer(a_pad, xw, b, w_next, *, project, tile_rows, tile_k,
                  out_dtype, vmem_cap):
    n_pad, c_pad = xw.shape
    grid = (n_pad // tile_rows, n_pad // tile_k)
    out_isz = jnp.dtype(out_dtype).itemsize
    bytes_accessed = (n_pad * n_pad * 2            # A streamed exactly once
                      + n_pad * c_pad * 2          # XW read once (resident)
                      + c_pad * 4 + c_pad * c_pad * 2
                      + n_pad * c_pad * out_isz)
    flops = 2 * n_pad * n_pad * c_pad + (2 * n_pad * c_pad * c_pad if project else 0)
    vmem_need = (2 * tile_rows * tile_k * 2        # A, double-buffered
                 + 2 * n_pad * c_pad * 2           # XW resident (+ pipeline copy)
                 + 2 * tile_rows * c_pad * out_isz
                 + tile_rows * c_pad * 4           # f32 accumulator
                 + 2 * c_pad * c_pad * 2 + (2 << 20))

    return pl.pallas_call(
        functools.partial(agg_kernel, tile_k=tile_k, project=project),
        out_shape=jax.ShapeDtypeStruct((n_pad, c_pad), out_dtype),
        grid_spec=pltpu.PrefetchScalarGridSpec(
            num_scalar_prefetch=0,
            grid=grid,
            in_specs=[
                pl.BlockSpec((tile_rows, tile_k), lambda r, k: (r, k)),  # A
                pl.BlockSpec((n_pad, c_pad), lambda r, k: (0, 0)),       # XW resident
                pl.BlockSpec((1, c_pad), lambda r, k: (0, 0)),           # bias
                pl.BlockSpec((c_pad, c_pad), lambda r, k: (0, 0)),       # W_next
            ],
            out_specs=pl.BlockSpec((tile_rows, c_pad), lambda r, k: (r, 0)),
            scratch_shapes=[pltpu.VMEM((tile_rows, c_pad), jnp.float32)],
        ),
        cost_estimate=pl.CostEstimate(flops=int(flops), transcendentals=0,
                                      bytes_accessed=int(bytes_accessed)),
        compiler_params=pltpu.CompilerParams(
            dimension_semantics=("parallel", "arbitrary"),
            vmem_limit_bytes=_clamp_vmem(vmem_need, vmem_cap)),
    )(a_pad, xw, b, w_next)


# ----------------------------------------------------------------------------
# Glue: normalized adjacency (PyG gcn_norm), params, padding, forward
# ----------------------------------------------------------------------------
def build_norm_adj(edge_index, num_nodes, improved=False):
    """Dense symmetric-normalized adjacency matching PyG gcn_norm.

    add_remaining_self_loops semantics: self-loops are only added for nodes
    that do not already carry one (existing self-loop edges keep weight 1).
    """
    src = edge_index[0]
    dst = edge_index[1]
    e_w = jnp.ones(edge_index.shape[1], jnp.float32)
    fill = 2.0 if improved else 1.0
    is_self = (src == dst)
    has_loop = jnp.zeros((num_nodes,), jnp.float32).at[src].add(
        jnp.where(is_self, 1.0, 0.0)) > 0
    loop = jnp.arange(num_nodes, dtype=edge_index.dtype)
    loop_w = jnp.where(has_loop, 0.0, fill)   # zero-weight loop == no-op
    src = jnp.concatenate([src, loop])
    dst = jnp.concatenate([dst, loop])
    ew = jnp.concatenate([e_w, loop_w])
    deg = jnp.zeros((num_nodes,), jnp.float32).at[dst].add(ew)
    deg_inv_sqrt = jnp.where(deg > 0, jax.lax.rsqrt(deg), 0.0)
    norm = deg_inv_sqrt[src] * ew * deg_inv_sqrt[dst]
    # out[i] = sum_{edge j->i} norm * x[j]  =>  A[i, j] += norm
    a = jnp.zeros((num_nodes, num_nodes), jnp.float32).at[dst, src].add(norm)
    return a


def init_mesh_gcn_params(key, in_channels, hidden_channels, out_channels,
                         num_layers=6):
    in_channels += 1  # mirrors `in_channels += 1` (sdf channel) in __init__
    channels = [in_channels] + [hidden_channels] * (num_layers - 1) + [out_channels]
    params = []
    for i in range(num_layers):
        key, wk = jax.random.split(key)
        fan_in, fan_out = channels[i], channels[i + 1]
        s = jnp.sqrt(6.0 / (fan_in + fan_out))  # glorot uniform (PyG default)
        w = jax.random.uniform(wk, (fan_in, fan_out), jnp.float32, -s, s)
        b = jnp.zeros((1, fan_out), jnp.float32)  # PyG GCNConv bias init: zeros
        params.append((w, b))
    return params, channels


def pack_params(params, c_pad):
    """Stack per-layer (W, b), zero-padded to [L, Cp, Cp] bf16 / [L, 1, Cp] f32."""
    num_layers = len(params)
    w_stack = jnp.zeros((num_layers, c_pad, c_pad), jnp.bfloat16)
    b_stack = jnp.zeros((num_layers, 1, c_pad), jnp.float32)
    for i, (w, b) in enumerate(params):
        cin, cout = w.shape
        w_stack = w_stack.at[i, :cin, :cout].set(w.astype(jnp.bfloat16))
        b_stack = b_stack.at[i, 0, :cout].set(b.reshape(-1))
    return w_stack, b_stack


def _choose_node_padding(n):
    # Keep the dominant n^2 A term small: 256 (MXU-width multiple) for large
    # meshes, 16 (bf16 sublane pack) for small ones.
    if n >= 1024:
        return _round_up(n, 256)
    return _round_up(n, 16)


def _choose_fallback_tiles(n_pad, c_pad, vmem_cap):
    budget = vmem_cap - (8 << 20)
    tile_rows = _largest_divisor(n_pad, (512, 256, 128, 64, 32, 16, 8))
    fixed = (2 * n_pad * c_pad * 2            # XW resident (+ copy)
             + 2 * tile_rows * c_pad * 4      # output blocks
             + tile_rows * c_pad * 4          # accumulator
             + 2 * c_pad * c_pad * 2 + (2 << 20))
    tile_k = None
    for cand in (n_pad, 8192, 4096, 2048, 1024, 512, 256, 128):
        if cand <= n_pad and n_pad % cand == 0 and \
                fixed + 2 * tile_rows * cand * 2 <= budget:
            tile_k = cand
            break
    if tile_k is None:
        tile_k = 128 if n_pad % 128 == 0 else n_pad
    return tile_rows, tile_k


def mesh_gcn_forward(params, x, edge_index, *, force_tiled=False):
    """x: [N, in_channels+1] float32, edge_index: [2, E] int32."""
    n, c_in = x.shape
    num_layers = len(params)
    c_out = params[-1][0].shape[1]
    c_max = max(c_in, max(max(w.shape[0], w.shape[1]) for w, _ in params))
    c_pad = _round_up(c_max, LANES)

    n_pad = _choose_node_padding(n)
    vmem_cap = _vmem_capacity_bytes()

    # Dense normalized adjacency (bf16), zero-padded; padded rows/cols are zero
    # so they never contaminate real nodes and are sliced off at the end.
    a = build_norm_adj(edge_index, n, improved=False)
    a_pad = jnp.zeros((n_pad, n_pad), jnp.bfloat16).at[:n, :n].set(
        a.astype(jnp.bfloat16))
    x_pad = jnp.zeros((n_pad, c_pad), jnp.bfloat16).at[:n, :c_in].set(
        x.astype(jnp.bfloat16))

    w_stack, b_stack = pack_params(params, c_pad)

    # Fused A-resident path whenever it fits this generation's VMEM (including
    # the in-kernel f32 temporaries), else the per-layer tiled fallback.
    fused_need = _fused_vmem_need(n_pad, c_pad, num_layers)
    fits = fused_need <= (vmem_cap - (10 << 20))

    if fits and not force_tiled:
        out_pad = mesh_gcn_fused(a_pad, x_pad, w_stack, b_stack, vmem_cap)
    else:
        tile_rows, tile_k = _choose_fallback_tiles(n_pad, c_pad, vmem_cap)
        xw_tile = _largest_divisor(n_pad, (4096, 2048, 1024, 512, 256, 128,
                                           64, 32, 16, 8))
        xw = compute_xw(x_pad, w_stack[0], tile_rows=xw_tile, vmem_cap=vmem_cap)
        for i in range(num_layers):
            is_last = i == num_layers - 1
            w_next = w_stack[i + 1] if not is_last else w_stack[i]  # dummy, unused
            xw = gcn_agg_layer(
                a_pad, xw, b_stack[i], w_next,
                project=not is_last,
                tile_rows=tile_rows, tile_k=tile_k,
                out_dtype=jnp.float32 if is_last else jnp.bfloat16,
                vmem_cap=vmem_cap)
        out_pad = xw

    return out_pad[:n, :c_out]


def mesh_gcn_reference(params, x, edge_index):
    """Pure-JAX f32 reference of the PyTorch forward."""
    a = build_norm_adj(edge_index, x.shape[0], improved=False)
    h = x
    for i, (w, b) in enumerate(params):
        h = a @ (h @ w) + b
        if i < len(params) - 1:
            h = jnp.maximum(h, 0.0)
    return h


# ----------------------------------------------------------------------------
# Demo
# ----------------------------------------------------------------------------
if __name__ == "__main__":
    key = jax.random.PRNGKey(0)

    in_channels = 3       # module adds +1 -> node features have 4 channels
    hidden_channels = 32
    out_channels = 4
    num_layers = 6
    num_nodes = 16
    num_edges = 40

    kx, ke, kp = jax.random.split(key, 3)
    x = jax.random.normal(kx, (num_nodes, in_channels + 1), jnp.float32)
    edge_index = jax.random.randint(ke, (2, num_edges), 0, num_nodes,
                                    dtype=jnp.int32)

    params, _ = init_mesh_gcn_params(kp, in_channels, hidden_channels,
                                     out_channels, num_layers=num_layers)

    ref = mesh_gcn_reference(params, x, edge_index)

    # Main (fused, A-resident) path.
    out = mesh_gcn_forward(params, x, edge_index)
    jax.block_until_ready(out)
    assert out.shape == (num_nodes, out_channels)
    assert jnp.allclose(out, ref, atol=5e-2, rtol=5e-2)

    # Also exercise the tiled fallback path used for large meshes.
    out_tiled = mesh_gcn_forward(params, x, edge_index, force_tiled=True)
    jax.block_until_ready(out_tiled)
    assert out_tiled.shape == (num_nodes, out_channels)
    assert jnp.allclose(out_tiled, ref, atol=5e-2, rtol=5e-2)
    assert jnp.allclose(out, out_tiled, atol=3e-2, rtol=3e-2)

    print("KERNEL_OK")
</pallas_src>

<mosaic_0001>
module attributes {stable_mosaic.version = 11 : i64} {
  func.func @fused_gcn_kernel(%arg0: memref<16x16xbf16, #tpu.memory_space<vmem>>, %arg1: memref<16x128xbf16, #tpu.memory_space<vmem>>, %arg2: memref<6x128x128xbf16, #tpu.memory_space<vmem>>, %arg3: memref<6x1x128xf32, #tpu.memory_space<vmem>>, %arg4: memref<16x128xf32, #tpu.memory_space<vmem>>, %arg5: memref<16x128xbf16, #tpu.memory_space<vmem>>) attributes {dimension_semantics = [], scalar_prefetch = 0 : i64, scratch_operands = 1 : i64, tpu.core_type = #tpu.core_type<tc>} {
    %c0 = arith.constant 0 : index
    %c0_0 = arith.constant 0 : index
    %0 = vector.load %arg1[%c0, %c0_0] : memref<16x128xbf16, #tpu.memory_space<vmem>>, vector<16x128xbf16>
    %c0_1 = arith.constant 0 : index
    %c0_2 = arith.constant 0 : index
    %1 = vector.load %arg5[%c0_1, %c0_2] : memref<16x128xbf16, #tpu.memory_space<vmem>>, vector<16x128xbf16>
    tpu.vector_store %arg5[%c0_1, %c0_2], %0 {strides = array<i32>} : memref<16x128xbf16, #tpu.memory_space<vmem>>, vector<16x128xbf16>,
    %c0_i32 = arith.constant 0 : i32
    %c5_i32 = arith.constant 5 : i32
    %2 = arith.addi %c0_i32, %c5_i32 : i32
    %c1_i32 = arith.constant 1 : i32
    scf.for %arg6 = %c0_i32 to %2 step %c1_i32  : i32 {
      %c0_16 = arith.constant 0 : index
      %c0_17 = arith.constant 0 : index
      %15 = vector.load %arg5[%c0_16, %c0_17] : memref<16x128xbf16, #tpu.memory_space<vmem>>, vector<16x128xbf16>
      %16 = arith.index_cast %arg6 : i32 to index
      %c0_18 = arith.constant 0 : index
      %c0_19 = arith.constant 0 : index
      %17 = vector.load %arg2[%16, %c0_18, %c0_19] : memref<6x128x128xbf16, #tpu.memory_space<vmem>>, vector<1x128x128xbf16>
      %18 = vector.shape_cast %17 : vector<1x128x128xbf16> to vector<128x128xbf16>
      %cst_20 = arith.constant dense<0.000000e+00> : vector<16x128xf32>
      %19 = tpu.matmul %15, %18, %cst_20 {dimension_numbers = #tpu.dot_dimension_numbers<[1], [0], [0], [1], [0, 0, 1, 1], [], []>} : vector<16x128xbf16>, vector<128x128xbf16>, vector<16x128xf32> -> vector<16x128xf32>
      %c0_21 = arith.constant 0 : index
      %c0_22 = arith.constant 0 : index
      %20 = vector.load %arg0[%c0_21, %c0_22] : memref<16x16xbf16, #tpu.memory_space<vmem>>, vector<16x16xbf16>
      %21 = arith.truncf %19 : vector<16x128xf32> to vector<16x128xbf16>
      %cst_23 = arith.constant dense<0.000000e+00> : vector<16x128xf32>
      %22 = tpu.matmul %20, %21, %cst_23 {dimension_numbers = #tpu.dot_dimension_numbers<[1], [0], [0], [1], [0, 0, 1, 1], [], []>} : vector<16x16xbf16>, vector<16x128xbf16>, vector<16x128xf32> -> vector<16x128xf32>
      %23 = arith.index_cast %arg6 : i32 to index
      %c0_24 = arith.constant 0 : index
      %c0_25 = arith.constant 0 : index
      %24 = vector.load %arg3[%23, %c0_24, %c0_25] : memref<6x1x128xf32, #tpu.memory_space<vmem>>, vector<1x1x128xf32>
      %25 = vector.shape_cast %24 : vector<1x1x128xf32> to vector<1x128xf32>
      %26 = vector.broadcast %25 : vector<1x128xf32> to vector<16x128xf32>
      %27 = arith.addf %22, %26 : vector<16x128xf32>
      %cst_26 = arith.constant 0.000000e+00 : f32
      %28 = vector.broadcast %cst_26 : f32 to vector<16x128xf32>
      %29 = arith.maximumf %27, %28 : vector<16x128xf32>
      %30 = arith.truncf %29 : vector<16x128xf32> to vector<16x128xbf16>
      %c0_27 = arith.constant 0 : index
      %c0_28 = arith.constant 0 : index
      %31 = vector.load %arg5[%c0_27, %c0_28] : memref<16x128xbf16, #tpu.memory_space<vmem>>, vector<16x128xbf16>
      tpu.vector_store %arg5[%c0_27, %c0_28], %30 {strides = array<i32>} : memref<16x128xbf16, #tpu.memory_space<vmem>>, vector<16x128xbf16>,
    }
    %c5_i32_3 = arith.constant 5 : i32
    %c0_4 = arith.constant 0 : index
    %c0_5 = arith.constant 0 : index
    %3 = vector.load %arg5[%c0_4, %c0_5] : memref<16x128xbf16, #tpu.memory_space<vmem>>, vector<16x128xbf16>
    %c5 = arith.constant 5 : index
    %c0_6 = arith.constant 0 : index
    %c0_7 = arith.constant 0 : index
    %4 = vector.load %arg2[%c5, %c0_6, %c0_7] : memref<6x128x128xbf16, #tpu.memory_space<vmem>>, vector<1x128x128xbf16>
    %5 = vector.shape_cast %4 : vector<1x128x128xbf16> to vector<128x128xbf16>
    %cst = arith.constant dense<0.000000e+00> : vector<16x128xf32>
    %6 = tpu.matmul %3, %5, %cst {dimension_numbers = #tpu.dot_dimension_numbers<[1], [0], [0], [1], [0, 0, 1, 1], [], []>} : vector<16x128xbf16>, vector<128x128xbf16>, vector<16x128xf32> -> vector<16x128xf32>
    %c0_8 = arith.constant 0 : index
    %c0_9 = arith.constant 0 : index
    %7 = vector.load %arg0[%c0_8, %c0_9] : memref<16x16xbf16, #tpu.memory_space<vmem>>, vector<16x16xbf16>
    %8 = arith.truncf %6 : vector<16x128xf32> to vector<16x128xbf16>
    %cst_10 = arith.constant dense<0.000000e+00> : vector<16x128xf32>
    %9 = tpu.matmul %7, %8, %cst_10 {dimension_numbers = #tpu.dot_dimension_numbers<[1], [0], [0], [1], [0, 0, 1, 1], [], []>} : vector<16x16xbf16>, vector<16x128xbf16>, vector<16x128xf32> -> vector<16x128xf32>
    %c5_11 = arith.constant 5 : index
    %c0_12 = arith.constant 0 : index
    %c0_13 = arith.constant 0 : index
    %10 = vector.load %arg3[%c5_11, %c0_12, %c0_13] : memref<6x1x128xf32, #tpu.memory_space<vmem>>, vector<1x1x128xf32>
    %11 = vector.shape_cast %10 : vector<1x1x128xf32> to vector<1x128xf32>
    %12 = vector.broadcast %11 : vector<1x128xf32> to vector<16x128xf32>
    %13 = arith.addf %9, %12 : vector<16x128xf32>
    %c0_14 = arith.constant 0 : index
    %c0_15 = arith.constant 0 : index
    %14 = vector.load %arg4[%c0_14, %c0_15] : memref<16x128xf32, #tpu.memory_space<vmem>>, vector<16x128xf32>
    tpu.vector_store %arg4[%c0_14, %c0_15], %13 {strides = array<i32>} : memref<16x128xf32, #tpu.memory_space<vmem>>, vector<16x128xf32>,
    return
  }
}

</mosaic_0001>

<bundles_post_ra>
// kernel: tpu_custom_call.1
= control target key start
LH: loop header
LB: loop body
LE: loop exit
PB: predicated region body
PF: predicated region fallthrough
CT: control target
= control target key end

     0   :  { %9 = vsyncpa [#allocation4], 0  ;;  %s806_s0 = inlined_call_operand.hbm [shape: bf16[16,16], index: 0, kind: input, shape index: {}]   ;;  %s807_s1 = inlined_call_operand.hbm [shape: bf16[16,128], index: 1, kind: input, shape index: {}]   ;;  %s808_s2 = inlined_call_operand.hbm [shape: bf16[6,128,128], index: 2, kind: input, shape index: {}]   ;;  %s809_s3 = inlined_call_operand.vmem [shape: f32[6,1,128], index: 3, kind: input, shape index: {}]   ;;  %s810_s4 = inlined_call_operand.hbm [shape: f32[16,128], index: 4, kind: output, shape index: {}]  }
   0x1   :  { %10 = vsyncpa [#allocation7], 0 }
   0x2   :  { %11 = vsyncpa [#allocation5], 0  ;;  %s687_s15 = smov [#allocation6]   ;;  %s688_s17 = smov [#allocation3]  }
   0x3   :  { %s29_s16 = sshll.u32 %s687_s15, 4  ;;  %s17_s18 = sshll.u32 %s688_s17, 4  ;;  %s30_s16 = int_to_ptr.vmem [resolvable:$true] %s29_s16  ;;  %s724_s18 = int_to_ptr.vmem [resolvable:$true] %s17_s18 }
   0x4   :  { %s585_s21 = scalar_lea.hbm %s807_s1, 128 }
   0x5   :  { %p586_p0 = scmp.ne.s32.totalorder %s807_s1, %s585_s21  ;;  %p589_p1 = scmp.lt.u32.totalorder %s585_s21, %s807_s1 }
   0x7   :  { %p591_p2 = pnand %p589_p1, %p586_p0 }
   0x9   :  { %594 = shalt.err (!%p591_p2)
}
   0xa   :  { %s595_s26 = scalar_lea.vmem %s30_s16, 128  ;;  %p600_p4 = scmp.lt.s32.totalorder %s30_s16, %s30_s16 }
   0xb   :  { %p596_p3 = scmp.ne.s32.totalorder %s30_s16, %s595_s26  ;;  %p601_p5 = scmp.lt.s32.totalorder %s595_s26, %s595_s26 }
   0xd   :  { %p602_p6 = por %p601_p5, %p600_p4 }
   0xf   :  { %p603_p7 = pnand %p602_p6, %p596_p3 }
  0x11   :  { %606 = shalt.err (!%p603_p7)
}
  0x12   :  { %s689_s27 = smov 64   ;;  %s690_s28 = smov 4  }
  0x13   :  { %35 = dma.hbm_to_vmem [thread:$0]  %s807_s1, 128, %s30_s16, [#allocation7], %s689_s27, %s689_s27, %s690_s28  }
  0x14   :  { %s607_s7 = scalar_lea.hbm %s806_s0, 128 }
  0x15   :  { %p608_p8 = scmp.ne.s32.totalorder %s806_s0, %s607_s7  ;;  %p611_p9 = scmp.lt.u32.totalorder %s607_s7, %s806_s0 }
  0x17   :  { %p613_p10 = pnand %p611_p9, %p608_p8 }
  0x19   :  { %616 = shalt.err (!%p613_p10)
}
  0x1a   :  { %s617_s12 = scalar_lea.vmem %s724_s18, 128  ;;  %p622_p12 = scmp.lt.s32.totalorder %s724_s18, %s724_s18 }
  0x1b   :  { %p618_p11 = scmp.ne.s32.totalorder %s724_s18, %s617_s12  ;;  %p623_p13 = scmp.lt.s32.totalorder %s617_s12, %s617_s12 }
  0x1d   :  { %p624_p0 = por %p623_p13, %p622_p12 }
  0x1f   :  { %p625_p1 = pnand %p624_p0, %p618_p11 }
  0x21   :  { %628 = shalt.err (!%p625_p1)
}
  0x22   :  { %23 = dma.hbm_to_vmem [thread:$0]  %s806_s0, 128, %s724_s18, [#allocation4], %s689_s27, %s689_s27, %s690_s28  }
  0x23   :  { %s691_s14 = smov [#allocation8]   ;;  %s629_s19 = scalar_lea.hbm %s808_s2, 6144 }
  0x24   :  { %s41_s15 = sshll.u32 %s691_s14, 4  ;;  %p630_p2 = scmp.ne.s32.totalorder %s808_s2, %s629_s19  ;;  %s42_s15 = int_to_ptr.vmem [resolvable:$true] %s41_s15 }
  0x25   :  { %p633_p3 = scmp.lt.u32.totalorder %s629_s19, %s808_s2 }
  0x27   :  { %p635_p4 = pnand %p633_p3, %p630_p2 }
  0x29   :  { %638 = shalt.err (!%p635_p4)
}
  0x2a   :  { %s639_s24 = scalar_lea.vmem %s42_s15, 6144  ;;  %p644_p6 = scmp.lt.s32.totalorder %s42_s15, %s42_s15 }
  0x2b   :  { %p640_p5 = scmp.ne.s32.totalorder %s42_s15, %s639_s24  ;;  %p645_p7 = scmp.lt.s32.totalorder %s639_s24, %s639_s24 }
  0x2d   :  { %p646_p8 = por %p645_p7, %p644_p6 }
  0x2f   :  { %p647_p9 = pnand %p646_p8, %p640_p5 }
  0x31   :  { %650 = shalt.err (!%p647_p9)
}
  0x32   :  { %47 = dma.hbm_to_vmem [thread:$0]  %s808_s2, 6144, %s42_s15, [#allocation7], %s689_s27, %s689_s27, %s690_s28  }
  0x33   :  { %677 = dma.done.wait [#allocation4], 128  }
  0x34   :  { %678 = vsyncadd [#allocation4], 4294967168 }
  0x35   :  { %679 = dma.done.wait [#allocation7], 6272  }
  0x36   :  { %680 = vsyncadd [#allocation7], 4294961024  ;;  %v566_v0 = vld [vmem:[#allocation6] sm:$0xff]   ;;  %s776_s25 = smov 0  }
  0x37   :  { %68 = vst [vmem:[#allocation2] sm:$0xff] %v566_v0 }
  0x38 LB: > { %v692_v1 = vmov 0.0   ;;  %vm693_vm0 = vmmov 0   ;;  %s471_s26 = sshll.u32 %s685_s25, 6  ;;  %v575_v16 = vld [vmem:[#allocation3] sm:$0xff]   ;;  %vm200_vm1 = vcmask 130048   ;;  %s187_s29 = scalar_lea.vmem %s809_s3, %s685_s25  ;;  %s685_s25 = sphi %s776_s25, %s74_s25  }
  0x39   : > { %494 = vmatprep.subr.bf16.mxu0 %v692_v1  ;;  %510 = vmatprep.mubr.msk.bf16.mxu0 %vm693_vm0, %v692_v1  ;;  %s78_s2 = scalar_lea.vmem [#allocation8], %s471_s26  ;;  %v456_v17 = vld [vmem:[%s187_s29] ss:$0 sm:$0xff]  ;;  %s74_s25 = sadd.s32 1, %s685_s25  }
  0x3a   : > { %514 = vmatprep.subr.bf16.mxu1 %v692_v1  ;;  %516 = vmatprep.mubr.msk.bf16.mxu1 %vm693_vm0, %v692_v1  ;;  %v567_v2 = vld [vmem:[%s78_s2] sm:$0xff]   ;;  %v568_v3 = vld [vmem:[%s78_s2 + $0x8] sm:$0xff]   ;;  %v569_v4 = vld [vmem:[%s78_s2 + $0x10] sm:$0xff]   ;;  %p71_p10 = scmp.ge.s32.totalorder %s74_s25, 5  }
  0x3b   : > { %495 = vmatpush3.bf16.msra.mxu0 %v567_v2  ;;  %v570_v5 = vld [vmem:[%s78_s2 + $0x18] sm:$0xff]   ;;  %v571_v6 = vld [vmem:[%s78_s2 + $0x20] sm:$0xff]   ;;  %v572_v7 = vld [vmem:[%s78_s2 + $0x28] sm:$0xff]   ;;  %v694_v28 = vmov (%p71_p10), 0.0   ;;  %vm695_vm2 = vmmov (%p71_p10), 0   ;;  %s696_s6 = smov (%p71_p10), [#allocation9]  }
  0x3c   : > { %496 = vmatprep.subr.bf16.mxu0 %v692_v1  ;;  %v573_v8 = vld [vmem:[%s78_s2 + $0x30] sm:$0xff]   ;;  %v574_v9 = vld [vmem:[%s78_s2 + $0x38] sm:$0xff]   ;;  %v577_v29 = vld [vmem:[#allocation8 + $0x148] sm:$0xff] (%p71_p10)   ;;  %s424_s7 = sshll.u32 (%p71_p10), %s696_s6, 4  ;;  %s425_s7 = int_to_ptr.vmem [resolvable:$true] %s424_s7 }
  0x3d   :  { %v576_v27 = vld [vmem:[#allocation8 + $0x140] sm:$0xff] (%p71_p10)   ;;  %v578_v30 = vld [vmem:[#allocation8 + $0x150] sm:$0xff] (%p71_p10)   ;;  %v579_v31 = vld [vmem:[#allocation8 + $0x158] sm:$0xff] (%p71_p10)   ;;  %s651_s8 = scalar_lea.vmem (%p71_p10), %s425_s7, 256  ;;  %p656_p12 = scmp.lt.s32.totalorder (%p71_p10), %s425_s7, %s425_s7 }
  0x3e   : > { %v75_v10 = vld [vmem:[#allocation2] sm:$0xff]  ;;  %v580_v32 = vld [vmem:[#allocation8 + $0x160] sm:$0xff] (%p71_p10)   ;;  %v582_v34 = vld [vmem:[#allocation8 + $0x170] sm:$0xff] (%p71_p10)   ;;  %p652_p11 = scmp.ne.s32.totalorder (%p71_p10), %s425_s7, %s651_s8  ;;  %p657_p13 = scmp.lt.s32.totalorder (%p71_p10), %s651_s8, %s651_s8 }
  0x3f   : > { %497 = vmatpush3.bf16.msra.mxu0 %v568_v3  ;;  %v581_v33 = vld [vmem:[#allocation8 + $0x168] sm:$0xff] (%p71_p10)   ;;  %v583_v35 = vld [vmem:[#allocation8 + $0x178] sm:$0xff] (%p71_p10)   ;;  %v584_v42 = vld [vmem:[#allocation3] sm:$0xff] (%p71_p10)  }
  0x40   : > { %498 = vmatprep.subr.bf16.mxu0 %v692_v1  ;;  %v468_v43 = vld [vmem:[%s809_s3 + $0x5] ss:$0 sm:$0xff] (%p71_p10)  ;;  %p658_p0 = por (%p71_p10), %p657_p13, %p656_p12 }
  0x42   :  { %p659_p1 = pnand (%p71_p10), %p658_p0, %p652_p11 }
  0x43   : > { %499 = vmatpush3.bf16.msra.mxu0 %v569_v4 }
  0x44   : > { %500 = vmatprep.subr.bf16.mxu0 %v692_v1 }
  0x47   : > { %501 = vmatpush3.bf16.msra.mxu0 %v570_v5 }
  0x48   : > { %502 = vmatprep.subr.bf16.mxu0 %v692_v1 }
  0x4b   : > { %503 = vmatpush3.bf16.msra.mxu0 %v571_v6 }
  0x4c   : > { %504 = vmatprep.subr.bf16.mxu0 %v692_v1 }
  0x4f   : > { %505 = vmatpush3.bf16.msra.mxu0 %v572_v7 }
  0x50   : > { %506 = vmatprep.subr.bf16.mxu0 %v692_v1 }
  0x53   : > { %507 = vmatpush3.bf16.msra.mxu0 %v573_v8 }
  0x54   : > { %508 = vmatprep.subr.bf16.mxu0 %v692_v1 }
  0x57   : > { %509 = vmatpush3.bf16.msra.mxu0 %v574_v9 }
  0x58   :  { %520 = vmatprep.subr.bf16.mxu0 (%p71_p10), %v694_v28 }
  0x5a   : > { %511 = vmatmul.mubr.bf16.vlgmr.msra.gmra.mrb[0].mxu0 %v75_v10 }
  0x5b   :  { %521 = vmatpush3.bf16.msra.mxu0 (%p71_p10), %v576_v27  ;;  %536 = vmatprep.mubr.msk.bf16.mxu0 (%p71_p10), %vm695_vm2, %v694_v28 }
  0x5c   :  { %522 = vmatprep.subr.bf16.mxu0 (%p71_p10), %v694_v28 }
  0x5f   :  { %523 = vmatpush3.bf16.msra.mxu0 (%p71_p10), %v577_v29 }
  0x60   :  { %524 = vmatprep.subr.bf16.mxu0 (%p71_p10), %v694_v28 }
  0x63   :  { %525 = vmatpush3.bf16.msra.mxu0 (%p71_p10), %v578_v30 }
  0x64   :  { %526 = vmatprep.subr.bf16.mxu0 (%p71_p10), %v694_v28 }
  0x67   :  { %527 = vmatpush3.bf16.msra.mxu0 (%p71_p10), %v579_v31 }
  0x68   :  { %528 = vmatprep.subr.bf16.mxu0 (%p71_p10), %v694_v28 }
  0x6b   :  { %529 = vmatpush3.bf16.msra.mxu0 (%p71_p10), %v580_v32 }
  0x6c   :  { %530 = vmatprep.subr.bf16.mxu0 (%p71_p10), %v694_v28 }
  0x6f   :  { %531 = vmatpush3.bf16.msra.mxu0 (%p71_p10), %v581_v33 }
  0x70   :  { %532 = vmatprep.subr.bf16.mxu0 (%p71_p10), %v694_v28 }
  0x73   :  { %533 = vmatpush3.bf16.msra.mxu0 (%p71_p10), %v582_v34 }
  0x74   :  { %534 = vmatprep.subr.bf16.mxu0 (%p71_p10), %v694_v28 }
  0x77   :  { %535 = vmatpush3.bf16.msra.mxu0 (%p71_p10), %v583_v35 }
 0x12d   : > { %v177_v11 = vpop.f32.mrb[0].mxu0 }
 0x12e   : > { %v512_v12 = vpop.f32.mrb[1].mxu0 }
 0x12f   : > { %v180_v13 = vpop.f32.mrb[2].mxu0 }
 0x130   : > { %v186_v14 = vpack.c.bf16 %v180_v13, %v177_v11  ;;  %v513_v15 = vpop.f32.mrb[3].mxu0 }
 0x132   : > { %515 = vmatpush3.bf16.msra.mxu1 %v186_v14 }
 0x133   :  { %540 = vmatprep.subr.bf16.mxu1 (%p71_p10), %v694_v28 }
 0x135   : > { %517 = vmatmul.mubr.msk.bf16.vlgmr.msra.gmra.mrb[0].mxu1 %vm200_vm1, %v575_v16 }
 0x136   :  { %542 = vmatprep.mubr.msk.bf16.mxu1 (%p71_p10), %vm695_vm2, %v694_v28 }
 0x208   : > { %v238_v18 = vpop.f32.mrb[0].mxu1 }
 0x209   : > { %v239_v19 = vadd.f32 %v456_v17, %v238_v18  ;;  %v518_v20 = vpop.f32.mrb[1].mxu1 }
 0x20a   : > { %v241_v21 = vpop.f32.mrb[2].mxu1 }
 0x20b   : > { %v242_v22 = vadd.f32 %v456_v17, %v241_v21  ;;  %v519_v23 = vpop.f32.mrb[3].mxu1  ;;  %v245_v24 = vmax.f32 %v239_v19, 0.0  ;;  %73 = sbr.rel (!%p71_p10) target bundleno = 56 (0x38), region = 59 }
 0x20d   : > { %v246_v25 = vmax.f32 %v242_v22, 0.0 }
 0x20f   : > { %v247_v26 = vpack.c.bf16 %v246_v25, %v245_v24 }
 0x211   : > { %248 = vst [vmem:[#allocation2] sm:$0xff] %v247_v26 }
 0x218   :  { %v249_v36 = vld [vmem:[#allocation2] sm:$0xff] }
 0x219   :  { %537 = vmatmul.mubr.bf16.vlgmr.msra.gmra.mrb[0].mxu0 %v249_v36 }
 0x2ec   :  { %v349_v37 = vpop.f32.mrb[0].mxu0 }
 0x2ed   :  { %v538_v38 = vpop.f32.mrb[1].mxu0 }
 0x2ee   :  { %v352_v39 = vpop.f32.mrb[2].mxu0 }
 0x2ef   :  { %v358_v40 = vpack.c.bf16 %v352_v39, %v349_v37  ;;  %v539_v41 = vpop.f32.mrb[3].mxu0 }
 0x2f1   :  { %541 = vmatpush3.bf16.msra.mxu1 %v358_v40 }
 0x2f4   :  { %543 = vmatmul.mubr.msk.bf16.vlgmr.msra.gmra.mrb[0].mxu1 %vm200_vm1, %v584_v42 }
 0x3c7   :  { %v410_v44 = vpop.f32.mrb[0].mxu1 }
 0x3c8   :  { %v411_v45 = vadd.f32 %v468_v43, %v410_v44  ;;  %v544_v46 = vpop.f32.mrb[1].mxu1 }
 0x3c9   :  { %v413_v47 = vpop.f32.mrb[2].mxu1 }
 0x3ca   :  { %417 = vst [vmem:[#allocation9] sm:$0xff] %v411_v45  ;;  %v414_v48 = vadd.f32 %v468_v43, %v413_v47  ;;  %v545_v49 = vpop.f32.mrb[3].mxu1 }
 0x3cc   :  { %418 = vst [vmem:[#allocation9 + $0x8] sm:$0xff] %v414_v48 }
 0x3cd   :  { %662 = shalt.err (!%p659_p1)
}
 0x3ce   :  { %s663_s10 = scalar_lea.hbm %s810_s4, 256 }
 0x3cf   :  { %p664_p2 = scmp.ne.s32.totalorder %s810_s4, %s663_s10  ;;  %p667_p3 = scmp.lt.u32.totalorder %s663_s10, %s810_s4 }
 0x3d1   :  { %p669_p4 = pnand %p667_p3, %p664_p2 }
 0x3d3   :  { %672 = shalt.err (!%p669_p4)
}
 0x3d4   :  { %s697_s14 = smov 128   ;;  %s698_s15 = smov 8  }
 0x3d5   :  { %430 = dma.vmem_to_hbm [thread:$0]  %s425_s7, 256, %s810_s4, [#allocation5], %s697_s14, %s697_s14, %s698_s15  }
 0x3d6   :  { %681 = dma.done.wait [#allocation5], 256  }
 0x3d7   :  { %682 = vsyncadd [#allocation5], 4294967040 }
 0x3d8   :  { %434 = vsyncpa [#allocation4], 1 }
 0x3d9   :  { %435 = vsyncpa [#allocation7], 1 }
 0x3da   :  { %436 = vsyncpa [#allocation5], 1 }

</bundles_post_ra>
